<compile_context>
chip_gen: v7x
topology: tpu7x:2x2x1
jax: 0.10.0
libtpu: 0.0.40
codegen_flags: <defaults>
</compile_context>

<pallas_src>
import functools

import jax
import jax.numpy as jnp
from jax.experimental import pallas as pl
from jax.experimental.pallas import tpu as pltpu

LANE = 128
SUBLANE = 8
DEFAULT_TT = 8          # time steps per sequential grid iteration (unrolled)
NEG_BIG = -1e30         # finite "-inf" folded into the pad-logit bias


def _round_up(n, m):
    return ((n + m - 1) // m) * m


# ---------------------------------------------------------------------------
# Kernel 1: batched input projection  xw = x @ Wx_fused + b_fused
# (parallel over row blocks; hoisted out of the sequential recurrence)
# ---------------------------------------------------------------------------
def input_proj_kernel(x_ref, wx_ref, b_ref, out_ref):
    out_ref[...] = (
        jnp.dot(x_ref[...], wx_ref[...], preferred_element_type=jnp.float32)
        + b_ref[...])


def _input_projection(xs_flat, wx, b, *, rows_per_block):
    R, I = xs_flat.shape
    F = wx.shape[1]
    return pl.pallas_call(
        input_proj_kernel,
        grid_spec=pltpu.PrefetchScalarGridSpec(
            num_scalar_prefetch=0,
            grid=(R // rows_per_block,),
            in_specs=[
                pl.BlockSpec((rows_per_block, I), lambda i: (i, 0)),
                pl.BlockSpec((I, F), lambda i: (0, 0)),   # resident weights
                pl.BlockSpec((1, F), lambda i: (0, 0)),   # resident bias(+mask)
            ],
            out_specs=pl.BlockSpec((rows_per_block, F), lambda i: (i, 0)),
        ),
        out_shape=jax.ShapeDtypeStruct((R, F), jnp.float32),
        compiler_params=pltpu.CompilerParams(
            dimension_semantics=("parallel",)),
    )(xs_flat, wx, b)


# ---------------------------------------------------------------------------
# Kernel 2: time-blocked sequential recurrence
#   for each step:  z = xw[t] + h @ Wh ;  h = z[:, :HP] ;
#                   out[t] = log_softmax(z[:, HP:])
# ---------------------------------------------------------------------------
def rnn_seq_kernel(xw_ref, h0_ref, wh_ref, out_ref, hfin_ref,
                   *, tt, hidden_pad, t_valid, t_padded):
    tb = pl.program_id(0)

    # Initialize the resident hidden carry (held in the final-hidden output
    # block, constant index_map => stays in VMEM across grid steps).
    @pl.when(tb == 0)
    def _():
        hfin_ref[...] = h0_ref[...]

    h = hfin_ref[...]            # (BP, HP)
    wh = wh_ref[...]             # (HP, HP + OP), resident
    guard = t_padded != t_valid  # static: only emit the select if T was padded

    # Fully unrolled inner loop over TT time steps; h lives in vregs.
    for i in range(tt):
        z = xw_ref[i] + jnp.dot(h, wh, preferred_element_type=jnp.float32)
        h_new = z[:, :hidden_pad]        # pad lanes stay exactly 0
        logits = z[:, hidden_pad:]       # pad lanes ~= -1e30 (bias-folded mask)

        # Numerically stable log-softmax (pad lanes underflow to 0 in exp).
        m = jnp.max(logits, axis=-1, keepdims=True)
        s = logits - m
        lse = jnp.log(jnp.sum(jnp.exp(s), axis=-1, keepdims=True))
        out_ref[i] = (s - lse).astype(out_ref.dtype)

        if guard:
            # Do not let padded trailing time steps corrupt the carry.
            h = jnp.where(tb * tt + i < t_valid, h_new, h)
        else:
            h = h_new

    # Single hidden store per block (not per step).
    hfin_ref[...] = h


def _rnn_sequence_call(xw, h0_pad, wh, *, tt, t_valid):
    T_pad, BP, F = xw.shape
    HP = wh.shape[0]
    OP = F - HP

    kernel = functools.partial(rnn_seq_kernel, tt=tt, hidden_pad=HP,
                               t_valid=t_valid, t_padded=T_pad)

    out_pad, h_final = pl.pallas_call(
        kernel,
        grid_spec=pltpu.PrefetchScalarGridSpec(
            num_scalar_prefetch=0,
            grid=(T_pad // tt,),
            in_specs=[
                pl.BlockSpec((tt, BP, F), lambda tb: (tb, 0, 0)),  # xw block
                pl.BlockSpec((BP, HP), lambda tb: (0, 0)),         # h0 (resident)
                pl.BlockSpec((HP, F), lambda tb: (0, 0)),          # Wh (resident)
            ],
            out_specs=[
                pl.BlockSpec((tt, BP, OP), lambda tb: (tb, 0, 0)),  # log-softmax
                pl.BlockSpec((BP, HP), lambda tb: (0, 0)),          # final hidden
            ],
        ),
        out_shape=(
            jax.ShapeDtypeStruct((T_pad, BP, OP), jnp.float32),
            jax.ShapeDtypeStruct((BP, HP), jnp.float32),
        ),
        compiler_params=pltpu.CompilerParams(
            dimension_semantics=("arbitrary",)),
    )(xw, h0_pad, wh)
    return out_pad, h_final


# ---------------------------------------------------------------------------
# Parameter packing (PyTorch nn.Linear layout -> padded fused kernel layout)
# ---------------------------------------------------------------------------
def pack_rnn_params(w_i2h, b_i2h, w_i2o, b_i2o,
                    input_size, hidden_size, output_size):
    """w_i2h: (H, I+H), b_i2h: (H,), w_i2o: (O, I+H), b_i2o: (O,).

    Returns (wx, wh, b, HP, OP):
      wx: (I, HP+OP), wh: (HP, HP+OP), b: (1, HP+OP).
    Hidden pad columns are zero; output pad columns of b are -1e30 so the
    kernel needs no explicit log-softmax lane mask.
    """
    HP = _round_up(hidden_size, LANE)
    OP = _round_up(output_size, LANE)
    F = HP + OP

    w_i2h_t = w_i2h.T            # (I+H, H)
    w_i2o_t = w_i2o.T            # (I+H, O)
    wx_h, wh_h = w_i2h_t[:input_size], w_i2h_t[input_size:]
    wx_o, wh_o = w_i2o_t[:input_size], w_i2o_t[input_size:]

    wx = jnp.zeros((input_size, F), jnp.float32)
    wx = wx.at[:, :hidden_size].set(wx_h)
    wx = wx.at[:, HP:HP + output_size].set(wx_o)

    wh = jnp.zeros((HP, F), jnp.float32)
    wh = wh.at[:hidden_size, :hidden_size].set(wh_h)
    wh = wh.at[:hidden_size, HP:HP + output_size].set(wh_o)

    b = jnp.full((1, F), 0.0, jnp.float32)
    b = b.at[0, :hidden_size].set(b_i2h)
    b = b.at[0, HP:HP + output_size].set(b_i2o)
    b = b.at[0, HP + output_size:].set(NEG_BIG)   # masks pad logit lanes
    return wx, wh, b, HP, OP


# ---------------------------------------------------------------------------
# Wrappers
# ---------------------------------------------------------------------------
def rnn_forward_sequence(xs, hidden, packed, hidden_size, output_size):
    """xs: (T, B, input_size), hidden: (B, hidden_size).
    Returns (log_softmax outputs (T, B, output_size), final hidden)."""
    wx, wh, b, HP, OP = packed
    T, B, I = xs.shape
    F = HP + OP

    BP = _round_up(max(B, SUBLANE), SUBLANE)
    tt = min(DEFAULT_TT, T)
    T_pad = _round_up(T, tt)

    xs_pad = jnp.zeros((T_pad, BP, I), jnp.float32)
    xs_pad = xs_pad.at[:T, :B].set(xs.astype(jnp.float32))

    # Hoisted input projection (bias + pad-logit mask already folded in).
    xw = _input_projection(xs_pad.reshape(T_pad * BP, I), wx, b,
                           rows_per_block=tt * BP)
    xw = xw.reshape(T_pad, BP, F)

    h0_pad = jnp.zeros((BP, HP), jnp.float32).at[:B, :hidden_size].set(hidden)

    out_pad, h_pad = _rnn_sequence_call(xw, h0_pad, wh, tt=tt, t_valid=T)
    return out_pad[:T, :B, :output_size], h_pad[:B, :hidden_size]


def rnn_forward(x, hidden, packed, hidden_size, output_size):
    """Single step, matching RNN.forward(input, hidden) -> (output, hidden)."""
    out, h = rnn_forward_sequence(x[None], hidden, packed,
                                  hidden_size, output_size)
    return out[0], h


if __name__ == "__main__":
    # Sizes consistent with the classic char-RNN tutorial:
    # input_size = len(ascii_letters + " .,;'") = 57, small hidden/output.
    input_size = 57
    hidden_size = 32
    output_size = 18
    batch = 2
    seq_len = 6          # e.g. the 6 characters of 'Albert'

    key = jax.random.PRNGKey(0)
    k_x, k_i2h_w, k_i2h_b, k_i2o_w, k_i2o_b = jax.random.split(key, 5)

    # Deterministic one-hot character sequence (like line_to_tensor rows).
    idx = jax.random.randint(k_x, (seq_len, batch), 0, input_size)
    xs = jax.nn.one_hot(idx, input_size, dtype=jnp.float32)       # (T, B, 57)
    hidden0 = jnp.zeros((batch, hidden_size), dtype=jnp.float32)  # (B, 32)

    # PyTorch-style nn.Linear init: U(-1/sqrt(fan_in), +1/sqrt(fan_in)),
    # weight stored (out_features, in_features) as in PyTorch.
    def init_linear(kw, kb, in_f, out_f):
        bound = 1.0 / jnp.sqrt(jnp.float32(in_f))
        w = jax.random.uniform(kw, (out_f, in_f), jnp.float32, -bound, bound)
        bias = jax.random.uniform(kb, (out_f,), jnp.float32, -bound, bound)
        return w, bias

    cin = input_size + hidden_size
    w_i2h, b_i2h = init_linear(k_i2h_w, k_i2h_b, cin, hidden_size)
    w_i2o, b_i2o = init_linear(k_i2o_w, k_i2o_b, cin, output_size)

    packed = pack_rnn_params(w_i2h, b_i2h, w_i2o, b_i2o,
                             input_size, hidden_size, output_size)

    # Fused-sequence kernels (projection pass + time-blocked recurrence) ...
    out_seq, h_final = rnn_forward_sequence(xs, hidden0, packed,
                                            hidden_size, output_size)
    # ... and the single-step API matching the PyTorch module's forward.
    out_step, h_step = rnn_forward(xs[0], hidden0, packed,
                                   hidden_size, output_size)
    jax.block_until_ready((out_seq, h_final, out_step, h_step))

    # Plain-JAX reference (PyTorch semantics: cat -> i2h / i2o -> log_softmax).
    def ref_step(x, h):
        c = jnp.concatenate([x, h], axis=1)
        h_new = c @ w_i2h.T + b_i2h
        out = jax.nn.log_softmax(c @ w_i2o.T + b_i2o, axis=1)
        return out, h_new

    h_ref = hidden0
    outs_ref = []
    for t in range(seq_len):
        o_ref, h_ref = ref_step(xs[t], h_ref)
        outs_ref.append(o_ref)
    outs_ref = jnp.stack(outs_ref)
    out0_ref, h0_ref = ref_step(xs[0], hidden0)

    assert out_seq.shape == (seq_len, batch, output_size)
    assert h_final.shape == (batch, hidden_size)
    assert jnp.allclose(out_seq, outs_ref, atol=1e-4), \
        float(jnp.max(jnp.abs(out_seq - outs_ref)))
    assert jnp.allclose(h_final, h_ref, atol=1e-4), \
        float(jnp.max(jnp.abs(h_final - h_ref)))
    assert jnp.allclose(out_step, out0_ref, atol=1e-4)
    assert jnp.allclose(h_step, h0_ref, atol=1e-4)

    print("KERNEL_OK")
</pallas_src>

<mosaic_0001>
module attributes {stable_mosaic.version = 11 : i64} {
  func.func @input_proj_kernel(%arg0: i32, %arg1: memref<48x57xf32, #tpu.memory_space<vmem>>, %arg2: memref<57x256xf32, #tpu.memory_space<vmem>>, %arg3: memref<1x256xf32, #tpu.memory_space<vmem>>, %arg4: memref<48x256xf32, #tpu.memory_space<vmem>>) attributes {dimension_semantics = [#tpu.dimension_semantics<parallel>], iteration_bounds = array<i64: 1>, scalar_prefetch = 0 : i64, scratch_operands = 0 : i64, tpu.core_type = #tpu.core_type<tc>, window_params = [{transform_indices = @transform_0, window_bounds = array<i64: 48, 57>}, {pipeline_mode = #tpu.pipeline_mode<synchronous>, transform_indices = @transform_1, window_bounds = array<i64: 57, 256>}, {pipeline_mode = #tpu.pipeline_mode<synchronous>, transform_indices = @transform_2, window_bounds = array<i64: 1, 256>}, {transform_indices = @transform_3, window_bounds = array<i64: 48, 256>}]} {
    %c0 = arith.constant 0 : index
    %c0_0 = arith.constant 0 : index
    %0 = vector.load %arg1[%c0, %c0_0] : memref<48x57xf32, #tpu.memory_space<vmem>>, vector<48x57xf32>
    %c0_1 = arith.constant 0 : index
    %c0_2 = arith.constant 0 : index
    %1 = vector.load %arg2[%c0_1, %c0_2] : memref<57x256xf32, #tpu.memory_space<vmem>>, vector<57x256xf32>
    %cst = arith.constant dense<0.000000e+00> : vector<48x256xf32>
    %2 = tpu.matmul %0, %1, %cst {dimension_numbers = #tpu.dot_dimension_numbers<[1], [0], [0], [1], [0, 0, 1, 1], [], []>} : vector<48x57xf32>, vector<57x256xf32>, vector<48x256xf32> -> vector<48x256xf32>
    %c0_3 = arith.constant 0 : index
    %c0_4 = arith.constant 0 : index
    %3 = vector.load %arg3[%c0_3, %c0_4] : memref<1x256xf32, #tpu.memory_space<vmem>>, vector<1x256xf32>
    %4 = vector.broadcast %3 : vector<1x256xf32> to vector<48x256xf32>
    %5 = arith.addf %2, %4 : vector<48x256xf32>
    %c0_5 = arith.constant 0 : index
    %c0_6 = arith.constant 0 : index
    %6 = vector.load %arg4[%c0_5, %c0_6] : memref<48x256xf32, #tpu.memory_space<vmem>>, vector<48x256xf32>
    tpu.vector_store %arg4[%c0_5, %c0_6], %5 {strides = array<i32>} : memref<48x256xf32, #tpu.memory_space<vmem>>, vector<48x256xf32>,
    return
  }
  func.func @transform_0(%arg0: i32) -> (i32, i32) {
    %c0_i32 = arith.constant 0 : i32
    %c0_i32_0 = arith.constant 0 : i32
    return %arg0, %c0_i32 : i32, i32
  }
  func.func @transform_1(%arg0: i32) -> (i32, i32) {
    %c0_i32 = arith.constant 0 : i32
    %c0_i32_0 = arith.constant 0 : i32
    %c0_i32_1 = arith.constant 0 : i32
    return %c0_i32, %c0_i32_0 : i32, i32
  }
  func.func @transform_2(%arg0: i32) -> (i32, i32) {
    %c0_i32 = arith.constant 0 : i32
    %c0_i32_0 = arith.constant 0 : i32
    %c0_i32_1 = arith.constant 0 : i32
    return %c0_i32, %c0_i32_0 : i32, i32
  }
  func.func @transform_3(%arg0: i32) -> (i32, i32) {
    %c0_i32 = arith.constant 0 : i32
    %c0_i32_0 = arith.constant 0 : i32
    return %arg0, %c0_i32 : i32, i32
  }
}

</mosaic_0001>

<bundles_post_ra>
// kernel: tpu_custom_call.1
= control target key start
LH: loop header
LB: loop body
LE: loop exit
PB: predicated region body
PF: predicated region fallthrough
CT: control target
= control target key end

     0   :  { %8 = vsyncpa [#allocation3], 0  ;;  %s423_s0 = inlined_call_operand.hbm [shape: f32[48,57], index: 0, kind: input, shape index: {}]   ;;  %s424_s1 = inlined_call_operand.hbm [shape: f32[57,256], index: 1, kind: input, shape index: {}]   ;;  %s425_s2 = inlined_call_operand.vmem [shape: f32[1,256], index: 2, kind: input, shape index: {}]   ;;  %s426_s3 = inlined_call_operand.hbm [shape: f32[48,256], index: 3, kind: output, shape index: {}]  }
   0x1   :  { %9 = vsyncpa [#allocation6], 0 }
   0x2   :  { %10 = vsyncpa [#allocation4], 0  ;;  %s349_s12 = smov [#allocation2]   ;;  %s277_s16 = scalar_lea.hbm %s423_s0, 768 }
   0x3   :  { %s16_s13 = sshll.u32 %s349_s12, 4  ;;  %p278_p0 = scmp.ne.s32.totalorder %s423_s0, %s277_s16  ;;  %s17_s13 = int_to_ptr.vmem [resolvable:$true] %s16_s13 }
   0x4   :  { %p281_p1 = scmp.lt.u32.totalorder %s277_s16, %s423_s0 }
   0x6   :  { %p283_p2 = pnand %p281_p1, %p278_p0 }
   0x8   :  { %286 = shalt.err (!%p283_p2)
}
   0x9   :  { %s287_s21 = scalar_lea.vmem %s17_s13, 768  ;;  %p292_p4 = scmp.lt.s32.totalorder %s17_s13, %s17_s13 }
   0xa   :  { %p288_p3 = scmp.ne.s32.totalorder %s17_s13, %s287_s21  ;;  %p293_p5 = scmp.lt.s32.totalorder %s287_s21, %s287_s21 }
   0xc   :  { %p294_p6 = por %p293_p5, %p292_p4 }
   0xe   :  { %p295_p7 = pnand %p294_p6, %p288_p3 }
  0x10   :  { %298 = shalt.err (!%p295_p7)
}
  0x11   :  { %s350_s22 = smov 128   ;;  %s351_s23 = smov 8  }
  0x12   :  { %22 = dma.hbm_to_vmem [thread:$0]  %s423_s0, 768, %s17_s13, [#allocation3], %s350_s22, %s350_s22, %s351_s23  }
  0x13   :  { %s352_s26 = smov [#allocation5]   ;;  %s299_s30 = scalar_lea.hbm %s424_s1, 2048 }
  0x14   :  { %s28_s27 = sshll.u32 %s352_s26, 4  ;;  %p300_p8 = scmp.ne.s32.totalorder %s424_s1, %s299_s30  ;;  %s29_s27 = int_to_ptr.vmem [resolvable:$true] %s28_s27 }
  0x15   :  { %p303_p9 = scmp.lt.u32.totalorder %s299_s30, %s424_s1 }
  0x17   :  { %p305_p10 = pnand %p303_p9, %p300_p8 }
  0x19   :  { %308 = shalt.err (!%p305_p10)
}
  0x1a   :  { %s309_s8 = scalar_lea.vmem %s29_s27, 2048  ;;  %p314_p12 = scmp.lt.s32.totalorder %s29_s27, %s29_s27 }
  0x1b   :  { %p310_p11 = scmp.ne.s32.totalorder %s29_s27, %s309_s8  ;;  %p315_p13 = scmp.lt.s32.totalorder %s309_s8, %s309_s8 }
  0x1d   :  { %p316_p0 = por %p315_p13, %p314_p12 }
  0x1f   :  { %p317_p1 = pnand %p316_p0, %p310_p11 }
  0x21   :  { %320 = shalt.err (!%p317_p1)
}
  0x22   :  { %s353_s0 = smov 256   ;;  %s354_s9 = smov 16  }
  0x23   :  { %34 = dma.hbm_to_vmem [thread:$0]  %s424_s1, 2048, %s29_s27, [#allocation6], %s353_s0, %s353_s0, %s354_s9  }
  0x24   :  { %343 = dma.done.wait [#allocation3], 768  }
  0x25   :  { %344 = vsyncadd [#allocation3], 4294966528 }
  0x26   :  { %345 = dma.done.wait [#allocation6], 2048  }
  0x27   :  { %346 = vsyncadd [#allocation6], 4294965248  ;;  %v355_v0 = vmov 0.0   ;;  %v50_v1 = vld [vmem:[#allocation5 + $0x8] sm:$0xff]  ;;  %v52_v2 = vld [vmem:[#allocation5 + $0x18] sm:$0xff]  ;;  %vm96_vm0 = vcmask 1040384   ;;  %v67_v31 = vlaneseq }
  0x28   :  { %167 = vmatprep.mubr.f32.mxu0 %v355_v0  ;;  %185 = vmatprep.mubr.f32.mxu1 %v355_v0  ;;  %v49_v3 = vld [vmem:[#allocation5] sm:$0xff]  ;;  %v242_v4 = vpack.c.bf16 %v52_v2, %v50_v1  ;;  %v51_v5 = vld [vmem:[#allocation5 + $0x10] sm:$0xff]  ;;  %v54_v6 = vld [vmem:[#allocation5 + $0x28] sm:$0xff]  ;;  %vm356_vm1 = vmmov 1   ;;  %vm77_vm3 = vcmask 465920  }
  0x29   :  { %v56_v7 = vld [vmem:[#allocation5 + $0x38] sm:$0xff]  ;;  %v244_v8 = vpack.c.bf16 %v51_v5, %v49_v3  ;;  %v53_v10 = vld [vmem:[#allocation5 + $0x20] sm:$0xff]  ;;  %v55_v11 = vld [vmem:[#allocation5 + $0x30] sm:$0xff]  ;;  %v68_v32 = vshrl.u32 %v67_v31, 7 }
  0x2a   :  { %v246_v9 = vpack.c.bf16 %v56_v7, %v54_v6  ;;  %v58_v12 = vld [vmem:[#allocation5 + $0x48] sm:$0xff]  ;;  %243 = vmatprep.subr.bf16.mxu0 %v242_v4  ;;  %260 = vmatprep.subr.bf16.mxu1 %v242_v4  ;;  %v60_v13 = vld [vmem:[#allocation5 + $0x58] sm:$0xff]  ;;  %v248_v14 = vpack.c.bf16 %v55_v11, %v53_v10  ;;  %v57_v16 = vld [vmem:[#allocation5 + $0x40] sm:$0xff] }
  0x2b   :  { %245 = vmatpush1.bf16.msra.mxu0 %v244_v8  ;;  %264 = vmatpush1.bf16.msra.mxu1 %v244_v8  ;;  %v250_v15 = vpack.c.bf16 %v60_v13, %v58_v12  ;;  %v59_v17 = vld [vmem:[#allocation5 + $0x50] sm:$0xff]  ;;  %v62_v18 = vld [vmem:[#allocation5 + $0x68] sm:$0xff]  ;;  %v64_v19 = vld [vmem:[#allocation5 + $0x78] sm:$0x1]  ;;  %v69_v33 = vsub.s32 0, %v68_v32  ;;  %v73_v35 = vsub.s32 1, %v68_v32 }
  0x2c   :  { %247 = vmatprep.subr.bf16.mxu0 %v246_v9  ;;  %261 = vmatprep.subr.bf16.mxu1 %v246_v9  ;;  %v252_v20 = vpack.c.bf16 %v59_v17, %v57_v16  ;;  %v254_v21 = vpack.c.bf16 %v64_v19, %v62_v18  ;;  %v61_v22 = vld [vmem:[#allocation5 + $0x60] sm:$0xff]  ;;  %v63_v23 = vld [vmem:[#allocation5 + $0x70] sm:$0x1]  ;;  %vm255_vm2 = vmpackc.low %vm96_vm0, %vm356_vm1 }
  0x2d   :  { %v257_v24 = vpack.c.bf16 %v63_v23, %v61_v22  ;;  %v43_v25 = vld [vmem:[#allocation2] sm:$0xff]  ;;  %v46_v26 = vld [vmem:[#allocation2 + $0x18] sm:$0xff]  ;;  %v44_v27 = vld [vmem:[#allocation2 + $0x8] sm:$0xff] }
  0x2e   :  { %v47_v28 = vld [vmem:[#allocation2 + $0x20] sm:$0xff]  ;;  %v45_v29 = vld [vmem:[#allocation2 + $0x10] sm:$0xff]  ;;  %v48_v30 = vld [vmem:[#allocation2 + $0x28] sm:$0xff] }
  0x2f   :  { %249 = vmatpush1.bf16.msra.mxu0 %v248_v14  ;;  %265 = vmatpush1.bf16.msra.mxu1 %v248_v14  ;;  %v65_v34 = vld [vmem:[%s425_s2] sm:$0x3]  ;;  %s357_s2 = smov [#allocation7]  }
  0x30   :  { %251 = vmatprep.subr.bf16.mxu0 %v250_v15  ;;  %262 = vmatprep.subr.bf16.mxu1 %v250_v15  ;;  %v70_v36 = vrot.slane %v65_v34, %v69_v33  ;;  %v74_v37 = vrot.slane %v65_v34, %v73_v35  ;;  %s221_s13 = sshll.u32 %s357_s2, 4  ;;  %s222_s13 = int_to_ptr.vmem [resolvable:$true] %s221_s13 }
  0x31   :  { %s321_s14 = scalar_lea.vmem %s222_s13, 1536  ;;  %p326_p3 = scmp.lt.s32.totalorder %s222_s13, %s222_s13 }
  0x32   :  { %p322_p2 = scmp.ne.s32.totalorder %s222_s13, %s321_s14  ;;  %p327_p4 = scmp.lt.s32.totalorder %s321_s14, %s321_s14 }
  0x33   :  { %253 = vmatpush1.bf16.msra.mxu0 %v252_v20  ;;  %266 = vmatpush1.bf16.msra.mxu1 %v252_v20 }
  0x34   :  { %256 = vmatprep.subr.msk.bf16.mxu0 %vm255_vm2, %v254_v21  ;;  %263 = vmatprep.subr.msk.bf16.mxu1 %vm255_vm2, %v254_v21  ;;  %p328_p5 = por %p327_p4, %p326_p3 }
  0x36   :  { %p329_p6 = pnand %p328_p5, %p322_p2 }
  0x37   :  { %259 = vmatpush1.bf16.msk.msra.mxu0 %vm255_vm2, %v257_v24  ;;  %267 = vmatpush1.bf16.msk.msra.mxu1 %vm255_vm2, %v257_v24 }
  0x3a   :  { %236 = vmatmul.mubr.msk.f32.vlgmr.msra.gmra.mrb[0].mxu0 %vm77_vm3, %v43_v25  ;;  %239 = vmatmul.mubr.msk.f32.vlgmr.msra.gmra.mrb[0].mxu1 %vm77_vm3, %v46_v26 }
  0x3b   :  { %173 = vmatprep.mubr.f32.mxu0 %v355_v0  ;;  %191 = vmatprep.mubr.f32.mxu1 %v355_v0 }
  0x3e   :  { %237 = vmatmul.mubr.msk.f32.gmra.mrb[2].mxu0 %vm77_vm3, %v44_v27  ;;  %240 = vmatmul.mubr.msk.f32.gmra.mrb[2].mxu1 %vm77_vm3, %v47_v28 }
  0x3f   :  { %179 = vmatprep.mubr.f32.mxu0 %v355_v0  ;;  %197 = vmatprep.mubr.f32.mxu1 %v355_v0 }
  0x42   :  { %238 = vmatmul.mubr.msk.f32.gmra.mrb[4].mxu0 %vm77_vm3, %v45_v29  ;;  %241 = vmatmul.mubr.msk.f32.gmra.mrb[4].mxu1 %vm77_vm3, %v48_v30 }
 0x10d   :  { %v169_v38 = vpop.f32.mrb[0].mxu0  ;;  %v187_v39 = vpop.f32.mrb[0].mxu1 }
 0x10e   :  { %v170_v40 = vadd.f32 %v169_v38, %v70_v36  ;;  %v188_v41 = vadd.f32 %v187_v39, %v70_v36  ;;  %v171_v42 = vpop.f32.mrb[1].mxu0  ;;  %v189_v43 = vpop.f32.mrb[1].mxu1 }
 0x10f   :  { %v172_v44 = vadd.f32 %v171_v42, %v74_v37  ;;  %v190_v45 = vadd.f32 %v189_v43, %v74_v37 }
 0x110   :  { %204 = vst [vmem:[#allocation7] sm:$0xff] %v170_v40  ;;  %210 = vst [vmem:[#allocation7 + $0x30] sm:$0xff] %v188_v41 }
 0x111   :  { %205 = vst [vmem:[#allocation7 + $0x8] sm:$0xff] %v172_v44  ;;  %211 = vst [vmem:[#allocation7 + $0x38] sm:$0xff] %v190_v45  ;;  %v175_v46 = vpop.f32.mrb[2].mxu0  ;;  %v193_v47 = vpop.f32.mrb[2].mxu1 }
 0x112   :  { %v176_v48 = vadd.f32 %v175_v46, %v70_v36  ;;  %v194_v49 = vadd.f32 %v193_v47, %v70_v36  ;;  %v177_v50 = vpop.f32.mrb[3].mxu0  ;;  %v195_v51 = vpop.f32.mrb[3].mxu1 }
 0x113   :  { %v178_v52 = vadd.f32 %v177_v50, %v74_v37  ;;  %v196_v53 = vadd.f32 %v195_v51, %v74_v37 }
 0x114   :  { %206 = vst [vmem:[#allocation7 + $0x10] sm:$0xff] %v176_v48  ;;  %212 = vst [vmem:[#allocation7 + $0x40] sm:$0xff] %v194_v49 }
 0x115   :  { %207 = vst [vmem:[#allocation7 + $0x18] sm:$0xff] %v178_v52  ;;  %213 = vst [vmem:[#allocation7 + $0x48] sm:$0xff] %v196_v53  ;;  %v181_v54 = vpop.f32.mrb[4].mxu0  ;;  %v199_v55 = vpop.f32.mrb[4].mxu1 }
 0x116   :  { %v182_v56 = vadd.f32 %v181_v54, %v70_v36  ;;  %v200_v57 = vadd.f32 %v199_v55, %v70_v36  ;;  %v183_v58 = vpop.f32.mrb[5].mxu0  ;;  %v201_v59 = vpop.f32.mrb[5].mxu1 }
 0x117   :  { %v184_v60 = vadd.f32 %v183_v58, %v74_v37  ;;  %v202_v61 = vadd.f32 %v201_v59, %v74_v37 }
 0x118   :  { %208 = vst [vmem:[#allocation7 + $0x20] sm:$0xff] %v182_v56  ;;  %214 = vst [vmem:[#allocation7 + $0x50] sm:$0xff] %v200_v57 }
 0x119   :  { %209 = vst [vmem:[#allocation7 + $0x28] sm:$0xff] %v184_v60  ;;  %215 = vst [vmem:[#allocation7 + $0x58] sm:$0xff] %v202_v61 }
 0x11a   :  { %332 = shalt.err (!%p329_p6)
}
 0x11b   :  { %s333_s17 = scalar_lea.hbm %s426_s3, 1536 }
 0x11c   :  { %p334_p7 = scmp.ne.s32.totalorder %s426_s3, %s333_s17  ;;  %p337_p8 = scmp.lt.u32.totalorder %s333_s17, %s426_s3 }
 0x11e   :  { %p339_p9 = pnand %p337_p8, %p334_p7 }
 0x120   :  { %342 = shalt.err (!%p339_p9)
}
 0x121   :  { %227 = dma.vmem_to_hbm [thread:$0]  %s222_s13, 1536, %s426_s3, [#allocation4], %s353_s0, %s353_s0, %s354_s9  }
 0x122   :  { %347 = dma.done.wait [#allocation4], 1536  }
 0x123   :  { %348 = vsyncadd [#allocation4], 4294965760 }
 0x124   :  { %231 = vsyncpa [#allocation3], 1 }
 0x125   :  { %232 = vsyncpa [#allocation6], 1 }
 0x126   :  { %233 = vsyncpa [#allocation4], 1 }

</bundles_post_ra>
